<compile_context>
chip_gen: v7x
topology: tpu7x:2x2x1
jax: 0.10.0
libtpu: 0.0.40
codegen_flags: <defaults>
</compile_context>

<pallas_src>
import jax
import jax.numpy as jnp
from jax.experimental import pallas as pl
from jax.experimental.pallas import tpu as pltpu

LANE = 128      # lane width of a vreg (last dim)
SUBLANE = 8     # sublane count of a vreg (second-to-last dim)


def _round_up(x, m):
    return ((x + m - 1) // m) * m


def dqn_kernel(x_ref, w1_ref, b1_ref, w2_ref, b2_ref, w3_ref, b3_ref, o_ref):
    # One fused body per batch tile: 3 MXU matmuls (bf16 operands, f32
    # accumulation) + f32 VPU bias/ReLU epilogues.
    x = x_ref[...].astype(jnp.bfloat16)
    h1 = jnp.dot(x, w1_ref[...], preferred_element_type=jnp.float32) + b1_ref[...]
    h1 = jnp.maximum(h1, 0.0).astype(jnp.bfloat16)
    h2 = jnp.dot(h1, w2_ref[...], preferred_element_type=jnp.float32) + b2_ref[...]
    h2 = jnp.maximum(h2, 0.0).astype(jnp.bfloat16)
    q = jnp.dot(h2, w3_ref[...], preferred_element_type=jnp.float32) + b3_ref[...]
    o_ref[...] = q.astype(o_ref.dtype)


def pad_params(params):
    """One-time parameter prep for the kernel.

    * Hidden feature dims (fc1, fc2) are zero-padded to a multiple of 128
      lanes (exact: padded units get zero weight & bias, ReLU(0)=0, and they
      contribute nothing downstream).
    * Input (state_dim) and output (action_dim) feature dims are left
      unpadded -> no over-read of the state / over-write of the Q-values.
    * Weight matrices cast to bf16 (MXU bf16 rate); biases stay f32 and are
      added to the f32 accumulator in-kernel.
    """
    w1, b1, w2, b2, w3, b3 = params
    _, fc1 = w1.shape
    fc2, _ = w3.shape
    fc1_p = _round_up(fc1, LANE)
    fc2_p = _round_up(fc2, LANE)

    w1p = jnp.pad(w1.astype(jnp.float32),
                  ((0, 0), (0, fc1_p - fc1))).astype(jnp.bfloat16)
    b1p = jnp.pad(b1.reshape(1, -1).astype(jnp.float32), ((0, 0), (0, fc1_p - fc1)))
    w2p = jnp.pad(w2.astype(jnp.float32),
                  ((0, fc1_p - fc1), (0, fc2_p - fc2))).astype(jnp.bfloat16)
    b2p = jnp.pad(b2.reshape(1, -1).astype(jnp.float32), ((0, 0), (0, fc2_p - fc2)))
    w3p = jnp.pad(w3.astype(jnp.float32),
                  ((0, fc2_p - fc2), (0, 0))).astype(jnp.bfloat16)
    b3p = b3.reshape(1, -1).astype(jnp.float32)
    return w1p, b1p, w2p, b2p, w3p, b3p


def dqn_forward(state, padded_params, *, block_batch=512):
    """Fused DQN forward. `padded_params` must come from pad_params."""
    w1, b1, w2, b2, w3, b3 = padded_params
    batch, state_dim = state.shape
    assert w1.shape[0] == state_dim
    action_dim = w3.shape[1]

    # Batch tiling:
    #  * default 512-row tiles (above the per-grid-step overhead knee),
    #  * if the whole batch fits in one tile, split it into two so the
    #    "parallel" batch axis can shard across both TensorCores on v7x,
    #  * the last tile may be partial (pl.cdiv grid) -- Pallas masks the
    #    out-of-bounds writeback; garbage rows in a partial input tile only
    #    feed masked-out output rows, so no padding pass on the state.
    batch8 = _round_up(batch, SUBLANE)
    if batch8 <= block_batch:
        tb = max(SUBLANE, _round_up(pl.cdiv(batch8, 2), SUBLANE))
    else:
        tb = block_batch
    grid = (pl.cdiv(batch, tb),)

    return pl.pallas_call(
        dqn_kernel,
        out_shape=jax.ShapeDtypeStruct((batch, action_dim), jnp.float32),
        grid_spec=pltpu.PrefetchScalarGridSpec(
            num_scalar_prefetch=0,
            grid=grid,
            in_specs=[
                # Per-tile activations: last dim is the full (unpadded)
                # state_dim; tiles are double-buffered by the pipeline.
                pl.BlockSpec((tb, state_dim), lambda i: (i, 0)),
                # Weights/biases: index_map ignores i -> VMEM-resident, one DMA.
                pl.BlockSpec(w1.shape, lambda i: (0, 0)),
                pl.BlockSpec(b1.shape, lambda i: (0, 0)),
                pl.BlockSpec(w2.shape, lambda i: (0, 0)),
                pl.BlockSpec(b2.shape, lambda i: (0, 0)),
                pl.BlockSpec(w3.shape, lambda i: (0, 0)),
                pl.BlockSpec(b3.shape, lambda i: (0, 0)),
            ],
            out_specs=pl.BlockSpec((tb, action_dim), lambda i: (i, 0)),
        ),
        compiler_params=pltpu.CompilerParams(
            # Batch tiles are independent: lets v7x spread them over both TCs.
            dimension_semantics=("parallel",),
        ),
    )(state, w1, b1, w2, b2, w3, b3)


def init_linear(key, in_dim, out_dim):
    # Deterministic init mimicking nn.Linear's U(-1/sqrt(in), 1/sqrt(in)).
    kw, kb = jax.random.split(key)
    bound = 1.0 / jnp.sqrt(jnp.float32(in_dim))
    w = jax.random.uniform(kw, (in_dim, out_dim), jnp.float32, -bound, bound)
    b = jax.random.uniform(kb, (1, out_dim), jnp.float32, -bound, bound)
    return w, b


if __name__ == "__main__":
    # Small shapes consistent with the module's forward:
    # state_dim=8, fc1_dim=32, fc2_dim=32, action_dim=4, batch=8.
    batch, state_dim, fc1_dim, fc2_dim, action_dim = 8, 8, 32, 32, 4

    key = jax.random.PRNGKey(0)
    k_x, k1, k2, k3 = jax.random.split(key, 4)

    state = jax.random.normal(k_x, (batch, state_dim), jnp.float32)
    w1, b1 = init_linear(k1, state_dim, fc1_dim)
    w2, b2 = init_linear(k2, fc1_dim, fc2_dim)
    w3, b3 = init_linear(k3, fc2_dim, action_dim)
    params = (w1, b1, w2, b2, w3, b3)

    # One-time padding/casting of the parameters.
    padded_params = pad_params(params)

    q_vals = dqn_forward(state, padded_params)
    jax.block_until_ready(q_vals)

    # Pure-JAX f32 reference; kernel matmuls use bf16 operands with f32
    # accumulation, so the tolerance is bf16-appropriate.
    h1 = jnp.maximum(state @ w1 + b1, 0.0)
    h2 = jnp.maximum(h1 @ w2 + b2, 0.0)
    q_ref = h2 @ w3 + b3
    assert q_vals.shape == (batch, action_dim)
    assert jnp.allclose(q_vals, q_ref, atol=5e-2, rtol=5e-2), (
        float(jnp.max(jnp.abs(q_vals - q_ref))))

    print("KERNEL_OK")
</pallas_src>

<mosaic_0001>
module attributes {stable_mosaic.version = 11 : i64} {
  func.func @dqn_kernel(%arg0: i32, %arg1: memref<8x8xf32, #tpu.memory_space<vmem>>, %arg2: memref<8x128xbf16, #tpu.memory_space<vmem>>, %arg3: memref<1x128xf32, #tpu.memory_space<vmem>>, %arg4: memref<128x128xbf16, #tpu.memory_space<vmem>>, %arg5: memref<1x128xf32, #tpu.memory_space<vmem>>, %arg6: memref<128x4xbf16, #tpu.memory_space<vmem>>, %arg7: memref<1x4xf32, #tpu.memory_space<vmem>>, %arg8: memref<8x4xf32, #tpu.memory_space<vmem>>) attributes {dimension_semantics = [#tpu.dimension_semantics<parallel>], iteration_bounds = array<i64: 1>, scalar_prefetch = 0 : i64, scratch_operands = 0 : i64, tpu.core_type = #tpu.core_type<tc>, window_params = [{transform_indices = @transform_0, window_bounds = array<i64: 8, 8>}, {pipeline_mode = #tpu.pipeline_mode<synchronous>, transform_indices = @transform_1, window_bounds = array<i64: 8, 128>}, {pipeline_mode = #tpu.pipeline_mode<synchronous>, transform_indices = @transform_2, window_bounds = array<i64: 1, 128>}, {pipeline_mode = #tpu.pipeline_mode<synchronous>, transform_indices = @transform_3, window_bounds = array<i64: 128, 128>}, {pipeline_mode = #tpu.pipeline_mode<synchronous>, transform_indices = @transform_4, window_bounds = array<i64: 1, 128>}, {pipeline_mode = #tpu.pipeline_mode<synchronous>, transform_indices = @transform_5, window_bounds = array<i64: 128, 4>}, {pipeline_mode = #tpu.pipeline_mode<synchronous>, transform_indices = @transform_6, window_bounds = array<i64: 1, 4>}, {transform_indices = @transform_7, window_bounds = array<i64: 8, 4>}]} {
    %c0 = arith.constant 0 : index
    %c0_0 = arith.constant 0 : index
    %0 = vector.load %arg1[%c0, %c0_0] : memref<8x8xf32, #tpu.memory_space<vmem>>, vector<8x8xf32>
    %1 = arith.truncf %0 : vector<8x8xf32> to vector<8x8xbf16>
    %c0_1 = arith.constant 0 : index
    %c0_2 = arith.constant 0 : index
    %2 = vector.load %arg2[%c0_1, %c0_2] : memref<8x128xbf16, #tpu.memory_space<vmem>>, vector<8x128xbf16>
    %cst = arith.constant dense<0.000000e+00> : vector<8x128xf32>
    %3 = tpu.matmul %1, %2, %cst {dimension_numbers = #tpu.dot_dimension_numbers<[1], [0], [0], [1], [0, 0, 1, 1], [], []>} : vector<8x8xbf16>, vector<8x128xbf16>, vector<8x128xf32> -> vector<8x128xf32>
    %c0_3 = arith.constant 0 : index
    %c0_4 = arith.constant 0 : index
    %4 = vector.load %arg3[%c0_3, %c0_4] : memref<1x128xf32, #tpu.memory_space<vmem>>, vector<1x128xf32>
    %5 = vector.broadcast %4 : vector<1x128xf32> to vector<8x128xf32>
    %6 = arith.addf %3, %5 : vector<8x128xf32>
    %cst_5 = arith.constant 0.000000e+00 : f32
    %7 = vector.broadcast %cst_5 : f32 to vector<8x128xf32>
    %8 = arith.maximumf %6, %7 : vector<8x128xf32>
    %9 = arith.truncf %8 : vector<8x128xf32> to vector<8x128xbf16>
    %c0_6 = arith.constant 0 : index
    %c0_7 = arith.constant 0 : index
    %10 = vector.load %arg4[%c0_6, %c0_7] : memref<128x128xbf16, #tpu.memory_space<vmem>>, vector<128x128xbf16>
    %cst_8 = arith.constant dense<0.000000e+00> : vector<8x128xf32>
    %11 = tpu.matmul %9, %10, %cst_8 {dimension_numbers = #tpu.dot_dimension_numbers<[1], [0], [0], [1], [0, 0, 1, 1], [], []>} : vector<8x128xbf16>, vector<128x128xbf16>, vector<8x128xf32> -> vector<8x128xf32>
    %c0_9 = arith.constant 0 : index
    %c0_10 = arith.constant 0 : index
    %12 = vector.load %arg5[%c0_9, %c0_10] : memref<1x128xf32, #tpu.memory_space<vmem>>, vector<1x128xf32>
    %13 = vector.broadcast %12 : vector<1x128xf32> to vector<8x128xf32>
    %14 = arith.addf %11, %13 : vector<8x128xf32>
    %cst_11 = arith.constant 0.000000e+00 : f32
    %15 = vector.broadcast %cst_11 : f32 to vector<8x128xf32>
    %16 = arith.maximumf %14, %15 : vector<8x128xf32>
    %17 = arith.truncf %16 : vector<8x128xf32> to vector<8x128xbf16>
    %c0_12 = arith.constant 0 : index
    %c0_13 = arith.constant 0 : index
    %18 = vector.load %arg6[%c0_12, %c0_13] : memref<128x4xbf16, #tpu.memory_space<vmem>>, vector<128x4xbf16>
    %cst_14 = arith.constant dense<0.000000e+00> : vector<8x4xf32>
    %19 = tpu.matmul %17, %18, %cst_14 {dimension_numbers = #tpu.dot_dimension_numbers<[1], [0], [0], [1], [0, 0, 1, 1], [], []>} : vector<8x128xbf16>, vector<128x4xbf16>, vector<8x4xf32> -> vector<8x4xf32>
    %c0_15 = arith.constant 0 : index
    %c0_16 = arith.constant 0 : index
    %20 = vector.load %arg7[%c0_15, %c0_16] : memref<1x4xf32, #tpu.memory_space<vmem>>, vector<1x4xf32>
    %21 = vector.broadcast %20 : vector<1x4xf32> to vector<8x4xf32>
    %22 = arith.addf %19, %21 : vector<8x4xf32>
    %c0_17 = arith.constant 0 : index
    %c0_18 = arith.constant 0 : index
    %23 = vector.load %arg8[%c0_17, %c0_18] : memref<8x4xf32, #tpu.memory_space<vmem>>, vector<8x4xf32>
    tpu.vector_store %arg8[%c0_17, %c0_18], %22 {strides = array<i32>} : memref<8x4xf32, #tpu.memory_space<vmem>>, vector<8x4xf32>,
    return
  }
  func.func @transform_0(%arg0: i32) -> (i32, i32) {
    %c0_i32 = arith.constant 0 : i32
    %c0_i32_0 = arith.constant 0 : i32
    return %arg0, %c0_i32 : i32, i32
  }
  func.func @transform_1(%arg0: i32) -> (i32, i32) {
    %c0_i32 = arith.constant 0 : i32
    %c0_i32_0 = arith.constant 0 : i32
    %c0_i32_1 = arith.constant 0 : i32
    return %c0_i32, %c0_i32_0 : i32, i32
  }
  func.func @transform_2(%arg0: i32) -> (i32, i32) {
    %c0_i32 = arith.constant 0 : i32
    %c0_i32_0 = arith.constant 0 : i32
    %c0_i32_1 = arith.constant 0 : i32
    return %c0_i32, %c0_i32_0 : i32, i32
  }
  func.func @transform_3(%arg0: i32) -> (i32, i32) {
    %c0_i32 = arith.constant 0 : i32
    %c0_i32_0 = arith.constant 0 : i32
    %c0_i32_1 = arith.constant 0 : i32
    return %c0_i32, %c0_i32_0 : i32, i32
  }
  func.func @transform_4(%arg0: i32) -> (i32, i32) {
    %c0_i32 = arith.constant 0 : i32
    %c0_i32_0 = arith.constant 0 : i32
    %c0_i32_1 = arith.constant 0 : i32
    return %c0_i32, %c0_i32_0 : i32, i32
  }
  func.func @transform_5(%arg0: i32) -> (i32, i32) {
    %c0_i32 = arith.constant 0 : i32
    %c0_i32_0 = arith.constant 0 : i32
    %c0_i32_1 = arith.constant 0 : i32
    return %c0_i32, %c0_i32_0 : i32, i32
  }
  func.func @transform_6(%arg0: i32) -> (i32, i32) {
    %c0_i32 = arith.constant 0 : i32
    %c0_i32_0 = arith.constant 0 : i32
    %c0_i32_1 = arith.constant 0 : i32
    return %c0_i32, %c0_i32_0 : i32, i32
  }
  func.func @transform_7(%arg0: i32) -> (i32, i32) {
    %c0_i32 = arith.constant 0 : i32
    %c0_i32_0 = arith.constant 0 : i32
    return %arg0, %c0_i32 : i32, i32
  }
}

</mosaic_0001>

<bundles_post_ra>
// kernel: tpu_custom_call.1
= control target key start
LH: loop header
LB: loop body
LE: loop exit
PB: predicated region body
PF: predicated region fallthrough
CT: control target
= control target key end

     0   :  { %vm41_vm0 = vcmask 1043456   ;;  %v421_v0 = vmov 0.0   ;;  %vm422_vm1 = vmmov 0   ;;  %vm37_vm2 = vcmask 64512   ;;  %s552_s1 = inlined_call_operand.vmem [shape: bf16[8,128], index: 1, kind: input, shape index: {}]   ;;  %s553_s0 = inlined_call_operand.vmem [shape: f32[8,8], index: 0, kind: input, shape index: {}]   ;;  %s554_s3 = inlined_call_operand.vmem [shape: bf16[128,128], index: 3, kind: input, shape index: {}]   ;;  %s555_s5 = inlined_call_operand.vmem [shape: bf16[128,4], index: 5, kind: input, shape index: {}]   ;;  %s556_s2 = inlined_call_operand.vmem [shape: f32[1,128], index: 2, kind: input, shape index: {}]   ;;  %s557_s4 = inlined_call_operand.vmem [shape: f32[1,128], index: 4, kind: input, shape index: {}]   ;;  %s558_s6 = inlined_call_operand.vmem [shape: f32[1,4], index: 6, kind: input, shape index: {}]   ;;  %s559_s7 = inlined_call_operand.vmem [shape: f32[8,4], index: 7, kind: output, shape index: {}]  }
   0x1   :  { %357 = vmatprep.subr.bf16.mxu0 %v421_v0  ;;  %v29_v1 = vld [vmem:[%s552_s1] sm:$0xf]  ;;  %359 = vmatprep.mubr.msk.bf16.mxu0 %vm422_vm1, %v421_v0  ;;  %v406_v6 = vld [vmem:[%s554_s3 + $0x8] sm:$0xff]   ;;  %v407_v7 = vld [vmem:[%s554_s3 + $0x10] sm:$0xff]   ;;  %vm311_vm3 = vcmask 31744  }
   0x2   :  { %v27_v2 = vld [vmem:[%s553_s0] sm:$0xff]  ;;  %v43_v3 = vsel %vm41_vm0, %v29_v1, 0  ;;  %363 = vmatprep.subr.bf16.mxu1 %v421_v0  ;;  %379 = vmatprep.mubr.msk.bf16.mxu1 %vm422_vm1, %v421_v0  ;;  %v408_v8 = vld [vmem:[%s554_s3 + $0x18] sm:$0xff]   ;;  %v410_v10 = vld [vmem:[%s554_s3 + $0x28] sm:$0xff]  }
   0x3   :  { %v28_v4 = vpack.c.bf16 %v27_v2, %v27_v2  ;;  %v405_v5 = vld [vmem:[%s554_s3] sm:$0xff]   ;;  %358 = vmatpush3.bf16.msra.mxu0 %v43_v3  ;;  %v411_v11 = vld [vmem:[%s554_s3 + $0x30] sm:$0xff]   ;;  %v412_v12 = vld [vmem:[%s554_s3 + $0x38] sm:$0xff]  }
   0x4   :  { %364 = vmatpush3.bf16.msra.mxu1 %v405_v5  ;;  %383 = vmatprep.subr.bf16.mxu0 %v421_v0  ;;  %v409_v9 = vld [vmem:[%s554_s3 + $0x20] sm:$0xff]   ;;  %v414_v14 = vld [vmem:[%s555_s5 + $0x8] sm:$0xff]   ;;  %v415_v15 = vld [vmem:[%s555_s5 + $0x10] sm:$0xff]  }
   0x5   :  { %365 = vmatprep.subr.bf16.mxu1 %v421_v0  ;;  %v413_v13 = vld [vmem:[%s555_s5] sm:$0xff]   ;;  %v416_v16 = vld [vmem:[%s555_s5 + $0x18] sm:$0xff]   ;;  %v418_v18 = vld [vmem:[%s555_s5 + $0x28] sm:$0xff]  }
   0x6   :  { %360 = vmatmul.mubr.msk.bf16.vlgmr.msra.gmra.mrb[0].mxu0 %vm37_vm2, %v28_v4  ;;  %v417_v17 = vld [vmem:[%s555_s5 + $0x20] sm:$0xff]   ;;  %v419_v27 = vld [vmem:[%s555_s5 + $0x30] sm:$0xff]   ;;  %v420_v28 = vld [vmem:[%s555_s5 + $0x38] sm:$0xff]  }
   0x7   :  { %399 = vmatprep.mubr.msk.bf16.mxu0 %vm422_vm1, %v421_v0  ;;  %384 = vmatpush3.bf16.msra.mxu0 %v413_v13  ;;  %v317_v19 = vld [vmem:[%s556_s2] ss:$0 sm:$0xff] }
   0x8   :  { %366 = vmatpush3.bf16.msra.mxu1 %v406_v6  ;;  %385 = vmatprep.subr.bf16.mxu0 %v421_v0  ;;  %v319_v29 = vld [vmem:[%s557_s4] ss:$0 sm:$0xff] }
   0x9   :  { %367 = vmatprep.subr.bf16.mxu1 %v421_v0  ;;  %v328_v37 = vld [vmem:[%s558_s6] ss:$0 sm:$0xff] }
   0xb   :  { %386 = vmatpush3.bf16.msra.mxu0 %v414_v14 }
   0xc   :  { %368 = vmatpush3.bf16.msra.mxu1 %v407_v7  ;;  %387 = vmatprep.subr.bf16.mxu0 %v421_v0 }
   0xd   :  { %369 = vmatprep.subr.bf16.mxu1 %v421_v0 }
   0xf   :  { %388 = vmatpush3.bf16.msra.mxu0 %v415_v15 }
  0x10   :  { %370 = vmatpush3.bf16.msra.mxu1 %v408_v8  ;;  %389 = vmatprep.subr.bf16.mxu0 %v421_v0 }
  0x11   :  { %371 = vmatprep.subr.bf16.mxu1 %v421_v0 }
  0x13   :  { %390 = vmatpush3.bf16.msra.mxu0 %v416_v16 }
  0x14   :  { %372 = vmatpush3.bf16.msra.mxu1 %v409_v9  ;;  %391 = vmatprep.subr.bf16.mxu0 %v421_v0 }
  0x15   :  { %373 = vmatprep.subr.bf16.mxu1 %v421_v0 }
  0x17   :  { %392 = vmatpush3.bf16.msra.mxu0 %v417_v17 }
  0x18   :  { %374 = vmatpush3.bf16.msra.mxu1 %v410_v10  ;;  %393 = vmatprep.subr.bf16.mxu0 %v421_v0 }
  0x19   :  { %375 = vmatprep.subr.bf16.mxu1 %v421_v0 }
  0x1b   :  { %394 = vmatpush3.bf16.msra.mxu0 %v418_v18 }
  0x1c   :  { %376 = vmatpush3.bf16.msra.mxu1 %v411_v11  ;;  %395 = vmatprep.subr.bf16.mxu0 %v421_v0 }
  0x1d   :  { %377 = vmatprep.subr.bf16.mxu1 %v421_v0 }
  0x1f   :  { %396 = vmatpush3.bf16.msra.mxu0 %v419_v27 }
  0x20   :  { %378 = vmatpush3.bf16.msra.mxu1 %v412_v12  ;;  %397 = vmatprep.subr.bf16.mxu0 %v421_v0 }
  0x23   :  { %398 = vmatpush3.bf16.msra.mxu0 %v420_v28 }
  0xd9   :  { %v79_v20 = vpop.f32.mrb[0].mxu0 }
  0xda   :  { %v80_v21 = vadd.f32 %v317_v19, %v79_v20  ;;  %v361_v22 = vpop.f32.mrb[1].mxu0 }
  0xdb   :  { %v82_v23 = vpop.f32.mrb[2].mxu0 }
  0xdc   :  { %v85_v24 = vmax.f32 %v80_v21, 0.0  ;;  %v362_v25 = vpop.f32.mrb[3].mxu0 }
  0xde   :  { %v86_v26 = vpack.c.bf16 %v85_v24, %v85_v24 }
  0xe0   :  { %380 = vmatmul.mubr.bf16.vlgmr.msra.gmra.mrb[0].mxu1 %v86_v26 }
 0x1b3   :  { %v192_v30 = vpop.f32.mrb[0].mxu1 }
 0x1b4   :  { %v193_v31 = vadd.f32 %v319_v29, %v192_v30  ;;  %v381_v32 = vpop.f32.mrb[1].mxu1 }
 0x1b5   :  { %v195_v33 = vpop.f32.mrb[2].mxu1 }
 0x1b6   :  { %v198_v34 = vmax.f32 %v193_v31, 0.0  ;;  %v382_v35 = vpop.f32.mrb[3].mxu1 }
 0x1b8   :  { %v199_v36 = vpack.c.bf16 %v198_v34, %v198_v34 }
 0x1ba   :  { %400 = vmatmul.mubr.bf16.vlgmr.msra.gmra.mrb[4].mxu0 %v199_v36 }
 0x28d   :  { %v305_v38 = vpop.f32.mrb[4].mxu0 }
 0x28e   :  { %v306_v39 = vadd.f32 %v328_v37, %v305_v38  ;;  %v401_v40 = vpop.f32.mrb[5].mxu0 }
 0x28f   :  { %v308_v41 = vpop.f32.mrb[6].mxu0 }
 0x290   :  { %312 = vst.msk [vmem:[%s559_s7] sm:$0xff] %vm311_vm3, %v306_v39  ;;  %v402_v42 = vpop.f32.mrb[7].mxu0 }

</bundles_post_ra>
